<compile_context>
chip_gen: v6e
topology: v6e:2x2x1
jax: 0.10.0
libtpu: 0.0.40
codegen_flags: <defaults>
</compile_context>

<pallas_src>
import jax
import jax.numpy as jnp
from jax.experimental import pallas as pl
from jax.experimental.pallas import tpu as pltpu


def _block_single_kernel(w_ref, x_ref, scale_ref, shift_ref, o_ref):
    # w_ref:     [TCO, K*Cin]   bf16  raw conv weights, rows tap-major (k*Cin + c)
    # x_ref:     [K*Cin, TL]    bf16  pre-staggered tap slab, batch packed on lanes
    # scale_ref: [TCO, 1]       f32   gamma / sqrt(var + eps)
    # shift_ref: [TCO, 1]       f32   (conv_bias - mean) * scale + beta
    # o_ref:     [TCO, TL]      out dtype
    acc = jax.lax.dot_general(                        # single MXU pass, K*Cin contraction
        w_ref[...], x_ref[...],
        dimension_numbers=(((1,), (0,)), ((), ())),
        preferred_element_type=jnp.float32)
    y = acc * scale_ref[...] + shift_ref[...]         # eval-mode BN in f32 epilogue
    o_ref[...] = jnp.maximum(y, 0.0).astype(o_ref.dtype)   # ReLU


def block_single_forward(x_ncl, conv_w, conv_b, bn_gamma, bn_beta,
                         bn_mean, bn_var, *, padding=1, eps=1e-5):
    """x_ncl: [B, Cin, L] (PyTorch NCL layout). Returns [B, Cout, L_out] (stride=1)."""
    B, Cin, L = x_ncl.shape
    Cout, _, K = conv_w.shape
    L_out = L + 2 * padding - K + 1
    out_dtype = x_ncl.dtype

    # Dropout1d: identity in eval mode (inference forward).

    # Eval-mode BatchNorm folded into per-channel scale/shift (applied in f32 epilogue).
    scale = (bn_gamma / jnp.sqrt(bn_var + eps)).astype(jnp.float32)          # [Cout]
    shift = ((conv_b - bn_mean) * scale + bn_beta).astype(jnp.float32)       # [Cout]

    # Weights: [Cout, Cin, K] -> [Cout, K*Cin], tap-major rows, bf16 for the MXU.
    w2 = jnp.transpose(conv_w, (0, 2, 1)).reshape(Cout, K * Cin).astype(jnp.bfloat16)

    # Input: zero-pad the conv halo, pre-stagger the K taps, pack batch into the lane
    # axis: slab[k*Cin + c, b*L_out + l] = x_pad[b, c, l + k].
    x_pad = jnp.pad(x_ncl, ((0, 0), (0, 0), (padding, padding))).astype(jnp.bfloat16)
    taps = jnp.stack([x_pad[:, :, k:k + L_out] for k in range(K)], axis=0)   # [K,B,Cin,Lo]
    slab = jnp.transpose(taps, (0, 2, 1, 3)).reshape(K * Cin, B * L_out)     # [K*Cin, B*Lo]

    # --- Tiling ---------------------------------------------------------------------
    TCO = Cout if Cout <= 128 else 128                 # Cout tile (second-to-last dim)
    n_co = pl.cdiv(Cout, TCO)
    Cout_pad = n_co * TCO

    BL = B * L_out                                      # packed lane axis
    MAX_TL = 2048                                       # keeps blocks inside scoped VMEM
    if BL <= MAX_TL:
        TL, n_bl, BL_pad = BL, 1, BL
    else:
        TL = MAX_TL
        n_bl = pl.cdiv(BL, TL)
        BL_pad = n_bl * TL

    # v7x has 2 TensorCores: make sure the parallel grid has >= 2 steps when possible.
    if n_co * n_bl == 1 and Cout >= 16 and Cout % 16 == 0:
        TCO = Cout // 2
        n_co = 2
        Cout_pad = Cout

    # Zero-pad to tile multiples (padded channels / lanes are sliced away afterwards).
    if Cout_pad > Cout:
        w2 = jnp.pad(w2, ((0, Cout_pad - Cout), (0, 0)))
        scale = jnp.pad(scale, ((0, Cout_pad - Cout),))
        shift = jnp.pad(shift, ((0, Cout_pad - Cout),))
    if BL_pad > BL:
        slab = jnp.pad(slab, ((0, 0), (0, BL_pad - BL)))
    scale2 = scale.reshape(Cout_pad, 1)
    shift2 = shift.reshape(Cout_pad, 1)

    # Explicit VMEM budget (fits v5e 16 MiB / v7x 32 MiB scoped defaults with headroom).
    itemsize_out = jnp.dtype(out_dtype).itemsize
    block_bytes = (K * Cin * TL * 2          # x slab block (bf16)
                   + TCO * TL * itemsize_out  # out block
                   + TCO * K * Cin * 2        # weight block (bf16)
                   + 2 * TCO * 4)             # scale + shift
    vmem_limit = int(min(max(3 * block_bytes, 8 * 2 ** 20), 48 * 2 ** 20))

    out_packed = pl.pallas_call(
        _block_single_kernel,
        out_shape=jax.ShapeDtypeStruct((Cout_pad, BL_pad), out_dtype),
        grid=(n_co, n_bl),
        in_specs=[
            pl.BlockSpec((TCO, K * Cin), lambda co, bl: (co, 0)),   # weights
            pl.BlockSpec((K * Cin, TL), lambda co, bl: (0, bl)),    # tap slab
            pl.BlockSpec((TCO, 1), lambda co, bl: (co, 0)),         # BN scale
            pl.BlockSpec((TCO, 1), lambda co, bl: (co, 0)),         # BN shift + bias
        ],
        out_specs=pl.BlockSpec((TCO, TL), lambda co, bl: (co, bl)),
        compiler_params=pltpu.CompilerParams(
            dimension_semantics=("parallel", "parallel"),
            vmem_limit_bytes=vmem_limit),
    )(w2, slab, scale2, shift2)

    # Unpack lanes: [Cout_pad, B*L_out(+pad)] -> [B, Cout, L_out] (layout plumbing only).
    out = out_packed[:Cout, :BL].reshape(Cout, B, L_out)
    return jnp.transpose(out, (1, 0, 2))


def _reference_forward(x_ncl, conv_w, conv_b, bn_gamma, bn_beta,
                       bn_mean, bn_var, *, padding=1, eps=1e-5):
    """Pure-JAX f32 reference (conv1d + eval-mode BN + ReLU) for validation."""
    y = jax.lax.conv_general_dilated(
        x_ncl.astype(jnp.float32), conv_w.astype(jnp.float32),
        window_strides=(1,), padding=[(padding, padding)],
        dimension_numbers=("NCH", "OIH", "NCH"))
    y = y + conv_b[None, :, None]
    y = (y - bn_mean[None, :, None]) / jnp.sqrt(bn_var[None, :, None] + eps)
    y = y * bn_gamma[None, :, None] + bn_beta[None, :, None]
    return jnp.maximum(y, 0.0)


if __name__ == "__main__":
    # Small shapes consistent with the module: x is [B, F, P] for Conv1d.
    B, Cin, L = 2, 4, 16
    Cout, K, padding = 8, 3, 1   # param_conv = dict(kernel_size=3, stride=1, padding=1)

    key = jax.random.PRNGKey(0)
    kx, kw, kb, kg, kbe, km, kv = jax.random.split(key, 7)

    x = jax.random.normal(kx, (B, Cin, L), dtype=jnp.float32)
    conv_w = 0.1 * jax.random.normal(kw, (Cout, Cin, K), dtype=jnp.float32)
    conv_b = 0.1 * jax.random.normal(kb, (Cout,), dtype=jnp.float32)
    bn_gamma = 1.0 + 0.1 * jax.random.normal(kg, (Cout,), dtype=jnp.float32)
    bn_beta = 0.1 * jax.random.normal(kbe, (Cout,), dtype=jnp.float32)
    bn_mean = 0.1 * jax.random.normal(km, (Cout,), dtype=jnp.float32)
    bn_var = jnp.abs(jax.random.normal(kv, (Cout,), dtype=jnp.float32)) + 0.5

    out = block_single_forward(x, conv_w, conv_b, bn_gamma, bn_beta, bn_mean, bn_var,
                               padding=padding)
    out = jax.block_until_ready(out)

    ref = _reference_forward(x, conv_w, conv_b, bn_gamma, bn_beta, bn_mean, bn_var,
                             padding=padding)
    assert out.shape == (B, Cout, L)
    # bf16 MXU inputs with f32 accumulation / f32 BN epilogue -> bf16-level tolerance.
    err = float(jnp.max(jnp.abs(out - ref)))
    assert jnp.allclose(out, ref, atol=3e-2, rtol=3e-2), f"max abs err {err}"

    print("KERNEL_OK")
</pallas_src>

<mosaic_0001>
module attributes {stable_mosaic.version = 11 : i64} {
  func.func @_block_single_kernel(%arg0: i32, %arg1: i32, %arg2: memref<8x12xbf16, #tpu.memory_space<vmem>>, %arg3: memref<12x32xbf16, #tpu.memory_space<vmem>>, %arg4: memref<8x1xf32, #tpu.memory_space<vmem>>, %arg5: memref<8x1xf32, #tpu.memory_space<vmem>>, %arg6: memref<8x32xf32, #tpu.memory_space<vmem>>) attributes {dimension_semantics = [#tpu.dimension_semantics<parallel>, #tpu.dimension_semantics<parallel>], iteration_bounds = array<i64: 1, 1>, scalar_prefetch = 0 : i64, scratch_operands = 0 : i64, tpu.core_type = #tpu.core_type<tc>, window_params = [{transform_indices = @transform_0, window_bounds = array<i64: 8, 12>}, {transform_indices = @transform_1, window_bounds = array<i64: 12, 32>}, {transform_indices = @transform_2, window_bounds = array<i64: 8, 1>}, {transform_indices = @transform_3, window_bounds = array<i64: 8, 1>}, {transform_indices = @transform_4, window_bounds = array<i64: 8, 32>}]} {
    %c0 = arith.constant 0 : index
    %c0_0 = arith.constant 0 : index
    %0 = vector.load %arg2[%c0, %c0_0] : memref<8x12xbf16, #tpu.memory_space<vmem>>, vector<8x12xbf16>
    %c0_1 = arith.constant 0 : index
    %c0_2 = arith.constant 0 : index
    %1 = vector.load %arg3[%c0_1, %c0_2] : memref<12x32xbf16, #tpu.memory_space<vmem>>, vector<12x32xbf16>
    %cst = arith.constant dense<0.000000e+00> : vector<8x32xf32>
    %2 = tpu.matmul %0, %1, %cst {dimension_numbers = #tpu.dot_dimension_numbers<[1], [0], [0], [1], [0, 0, 1, 1], [], []>} : vector<8x12xbf16>, vector<12x32xbf16>, vector<8x32xf32> -> vector<8x32xf32>
    %c0_3 = arith.constant 0 : index
    %c0_4 = arith.constant 0 : index
    %3 = vector.load %arg4[%c0_3, %c0_4] : memref<8x1xf32, #tpu.memory_space<vmem>>, vector<8x1xf32>
    %4 = vector.broadcast %3 : vector<8x1xf32> to vector<8x32xf32>
    %5 = arith.mulf %2, %4 : vector<8x32xf32>
    %c0_5 = arith.constant 0 : index
    %c0_6 = arith.constant 0 : index
    %6 = vector.load %arg5[%c0_5, %c0_6] : memref<8x1xf32, #tpu.memory_space<vmem>>, vector<8x1xf32>
    %7 = vector.broadcast %6 : vector<8x1xf32> to vector<8x32xf32>
    %8 = arith.addf %5, %7 : vector<8x32xf32>
    %cst_7 = arith.constant 0.000000e+00 : f32
    %9 = vector.broadcast %cst_7 : f32 to vector<8x32xf32>
    %10 = arith.maximumf %8, %9 : vector<8x32xf32>
    %c0_8 = arith.constant 0 : index
    %c0_9 = arith.constant 0 : index
    %11 = vector.load %arg6[%c0_8, %c0_9] : memref<8x32xf32, #tpu.memory_space<vmem>>, vector<8x32xf32>
    tpu.vector_store %arg6[%c0_8, %c0_9], %10 {strides = array<i32>} : memref<8x32xf32, #tpu.memory_space<vmem>>, vector<8x32xf32>,
    return
  }
  func.func @transform_0(%arg0: i32, %arg1: i32) -> (i32, i32) {
    %c0_i32 = arith.constant 0 : i32
    %c0_i32_0 = arith.constant 0 : i32
    return %arg0, %c0_i32 : i32, i32
  }
  func.func @transform_1(%arg0: i32, %arg1: i32) -> (i32, i32) {
    %c0_i32 = arith.constant 0 : i32
    %c0_i32_0 = arith.constant 0 : i32
    return %c0_i32, %arg1 : i32, i32
  }
  func.func @transform_2(%arg0: i32, %arg1: i32) -> (i32, i32) {
    %c0_i32 = arith.constant 0 : i32
    %c0_i32_0 = arith.constant 0 : i32
    return %arg0, %c0_i32 : i32, i32
  }
  func.func @transform_3(%arg0: i32, %arg1: i32) -> (i32, i32) {
    %c0_i32 = arith.constant 0 : i32
    %c0_i32_0 = arith.constant 0 : i32
    return %arg0, %c0_i32 : i32, i32
  }
  func.func @transform_4(%arg0: i32, %arg1: i32) -> (i32, i32) {
    %c0_i32 = arith.constant 0 : i32
    return %arg0, %arg1 : i32, i32
  }
}

</mosaic_0001>

<bundles_post_ra>
// kernel: tpu_custom_call.1
= control target key start
LH: loop header
LB: loop body
LE: loop exit
PB: predicated region body
PF: predicated region fallthrough
CT: control target
= control target key end

     0   :  { %vm31_vm0 = vcmask 1045504   ;;  %v144_v0 = vmov 0.0   ;;  %vm145_vm1 = vmmov 0   ;;  %s188_s0 = inlined_call_operand.vmem [shape: bf16[8,12], index: 0, kind: input, shape index: {}]   ;;  %s189_s1 = inlined_call_operand.vmem [shape: bf16[12,32], index: 1, kind: input, shape index: {}]   ;;  %s190_s2 = inlined_call_operand.vmem [shape: f32[8,1], index: 2, kind: input, shape index: {}]   ;;  %s191_s3 = inlined_call_operand.vmem [shape: f32[8,1], index: 3, kind: input, shape index: {}]   ;;  %s192_s4 = inlined_call_operand.hbm [shape: f32[8,32], index: 4, kind: output, shape index: {}]  }
   0x1   :  { %110 = vmatprep.subr.bf16.mxu0 %v144_v0  ;;  %v121_v1 = vld [vmem:[%s189_s1] sm:$0x3f]   ;;  %112 = vmatprep.mubr.msk.bf16.mxu0 %vm145_vm1, %v144_v0 }
   0x2   :  { %v75_v2 = vld [vmem:[%s190_s2] sm:$0xff] }
   0x3   :  { %9 = vsyncpa [#allocation3], 0  ;;  %v33_v3 = vsel %vm31_vm0, %v121_v1, 0  ;;  %v146_v4 = vmov 0   ;;  %v19_v5 = vld [vmem:[%s188_s0] sm:$0xf] }
   0x4   :  { %120 = vset.pattern.permute.xlu0 %v146_v4  ;;  %111 = vmatpush3.bf16.msra.mxu0 %v33_v3  ;;  %vm27_vm2 = vcmask 97280   ;;  %v82_v6 = vld [vmem:[%s191_s3] sm:$0xff]  ;;  %s147_s1 = smov [#allocation2]   ;;  %vm90_vm3 = vcmask 261120  }
   0x5   :  { %78 = vperm.xlu0 %120, %v75_v2   ;;  %s98_s2 = sshll.u32 %s147_s1, 4  ;;  %s99_s2 = int_to_ptr.vmem [resolvable:$true] %s98_s2 }
   0x6   :  { %s122_s0 = scalar_lea.vmem %s99_s2, 128  ;;  %p127_p1 = scmp.lt.s32.totalorder %s99_s2, %s99_s2 }
   0x7   :  { %113 = vmatmul.mubr.msk.bf16.vlgmr.msra.gmra.mxu0 %vm27_vm2, %v19_v5  ;;  %p123_p0 = scmp.ne.s32.totalorder %s99_s2, %s122_s0  ;;  %p128_p2 = scmp.lt.s32.totalorder %s122_s0, %s122_s0 }
   0x9   :  { %85 = vperm.xlu0 %120, %v82_v6   ;;  %p129_p3 = por %p128_p2, %p127_p1 }
   0xb   :  { %p130_p4 = pnand %p129_p3, %p123_p0 }
  0x80   :  { %v79_v7 = vpop.permute.xlu0 %78 }
  0x84   :  { %v86_v10 = vpop.permute.xlu0 %85 }
  0xc7   :  { %v69_v8 = vpop.f32.mrf.mxu0 }
  0xc8   :  { %v81_v9 = vmul.f32 %v79_v7, %v69_v8 }
  0xc9   :  { %v114_v11 = vpop.f32.mrf.mxu0 }
  0xca   :  { %v88_v12 = vadd.f32 %v86_v10, %v81_v9 }
  0xcb   :  { %v72_v13 = vpop.f32.mrf.mxu0 }
  0xcc   :  { %v89_v14 = vmax.f32 %v88_v12, 0.0 }
  0xcd   :  { %v115_v15 = vpop.f32.mrf.mxu0 }
  0xce   :  { %91 = vst.msk [vmem:[#allocation2] sm:$0xff] %vm90_vm3, %v89_v14 }
  0xcf   :  { %133 = shalt.err (!%p130_p4)
}
  0xd0   :  { %101 = dma.vmem_to_hbm [thread:$0]  %s99_s2, 128, %s192_s4, [#allocation3]  }
  0xd1   :  { %142 = dma.done.wait [#allocation3], 128  }
  0xd2   :  { %143 = vsyncadd [#allocation3], 4294967168 }
  0xd3   :  { %105 = vsyncpa [#allocation3], 1 }

</bundles_post_ra>
